<compile_context>
chip_gen: v5e
topology: v5e:2x2
jax: 0.10.0
libtpu: 0.0.40
codegen_flags: <defaults>
</compile_context>

<pallas_src>
import functools

import jax
import jax.numpy as jnp
from jax.experimental import pallas as pl
from jax.experimental.pallas import tpu as pltpu

_LANE = 128     # lane width (last dim of a vreg)
_SUBLANE = 8    # f32 sublane width (second-to-last dim of a vreg)


def _round_up(x, m):
    return ((x + m - 1) // m) * m


def _make_dqn_kernel(input_dim, vpu_first_layer):
    def dqn_kernel(x_ref, w1_ref, w2_ref, out_ref):
        x = x_ref[...]          # (TB, input_dim)
        w1 = w1_ref[...]        # (input_dim, hidden_pad)

        if vpu_first_layer:
            # K = input_dim is tiny (2 for MountainCar): a K-deep contraction
            # wastes an MXU pass + MRF drain.  Do it as `input_dim` broadcast
            # multiply-adds on the VPU instead.
            h = x[:, 0:1] * w1[0:1, :]
            for k in range(1, input_dim):
                h = h + x[:, k:k + 1] * w1[k:k + 1, :]
        else:
            h = jnp.dot(x, w1, preferred_element_type=jnp.float32)

        h = jnp.tanh(h)         # EUP

        # Second matmul (K = hidden_pad = 128) on the MXU, f32 accumulation.
        # out_pad = 128 -> lane-dense, unmasked stores.
        out_ref[...] = jnp.dot(
            h, w2_ref[...], preferred_element_type=jnp.float32
        ).astype(out_ref.dtype)

    return dqn_kernel


def dqn_forward(x, w1, w2, *, block_b=256):
    """DQN forward pass: tanh(x @ w1.T) @ w2.T (both Linear layers bias=False).

    x  : (B, input_dim)          float32 activations
    w1 : (hidden_dim, input_dim) PyTorch nn.Linear weight layout
    w2 : (output_dim, hidden_dim)
    Returns (B, output_dim).
    """
    B, input_dim = x.shape
    hidden_dim = w1.shape[0]
    out_dim = w2.shape[0]

    # ---- pad narrow feature dims to 128 lanes (lane-dense matmul + stores) ---
    hidden_pad = _round_up(hidden_dim, _LANE)
    out_pad = _round_up(out_dim, _LANE)

    w1_t = jnp.zeros((input_dim, hidden_pad), x.dtype)
    w1_t = w1_t.at[:, :hidden_dim].set(w1.T)           # (input_dim, hidden_pad)
    w2_t = jnp.zeros((hidden_pad, out_pad), x.dtype)
    w2_t = w2_t.at[:hidden_dim, :out_dim].set(w2.T)    # (hidden_pad, out_pad)

    # ---- tile the batch: weights resident, x/out tiles pipeline -------------
    tb = min(block_b, _round_up(B, _SUBLANE))
    tb = _round_up(tb, _SUBLANE)
    b_pad = _round_up(B, tb)
    if b_pad != B:
        x = jnp.pad(x, ((0, b_pad - B), (0, 0)))

    grid = (b_pad // tb,)
    kernel = _make_dqn_kernel(input_dim, vpu_first_layer=(input_dim <= 8))

    out = pl.pallas_call(
        kernel,
        out_shape=jax.ShapeDtypeStruct((b_pad, out_pad), x.dtype),
        grid_spec=pl.GridSpec(
            grid=grid,
            in_specs=[
                pl.BlockSpec((tb, input_dim), lambda i: (i, 0)),        # x tile
                pl.BlockSpec((input_dim, hidden_pad), lambda i: (0, 0)),  # W1 resident
                pl.BlockSpec((hidden_pad, out_pad), lambda i: (0, 0)),    # W2 resident
            ],
            out_specs=pl.BlockSpec((tb, out_pad), lambda i: (i, 0)),
        ),
        compiler_params=pltpu.CompilerParams(
            # Batch tiles are independent -> shard across the 2 TCs on v7x.
            dimension_semantics=("parallel",),
        ),
    )(x, w1_t, w2_t)

    return out[:B, :out_dim]


def dqn_reference(x, w1, w2):
    return jnp.tanh(x @ w1.T) @ w2.T


if __name__ == "__main__":
    # MountainCar-like sizes: observation dim 2, hidden 32, 3 actions.
    # Batch 256 with 128-row tiles exercises the batch grid (2 pipelined tiles).
    batch, input_dim, hidden_dim, output_dim = 256, 2, 32, 3

    key = jax.random.PRNGKey(0)
    kx, k1, k2 = jax.random.split(key, 3)

    x = jax.random.normal(kx, (batch, input_dim), dtype=jnp.float32)
    # PyTorch nn.Linear weight layout: (out_features, in_features).
    w1 = jax.random.normal(k1, (hidden_dim, input_dim), dtype=jnp.float32) * 0.1
    w2 = jax.random.normal(k2, (output_dim, hidden_dim), dtype=jnp.float32) * 0.1

    out = dqn_forward(x, w1, w2, block_b=128)
    jax.block_until_ready(out)

    ref = dqn_reference(x, w1, w2)
    assert out.shape == (batch, output_dim)
    assert jnp.allclose(out, ref, atol=1e-5, rtol=1e-5)

    # Ragged / tiny batch path (pads batch to a sublane multiple, slices back).
    x_small = x[:5]
    out_small = dqn_forward(x_small, w1, w2)
    jax.block_until_ready(out_small)
    assert out_small.shape == (5, output_dim)
    assert jnp.allclose(out_small, ref[:5], atol=1e-5, rtol=1e-5)

    print("KERNEL_OK")
</pallas_src>

<mosaic_0001>
module attributes {stable_mosaic.version = 11 : i64} {
  func.func @dqn_kernel(%arg0: i32, %arg1: memref<128x2xf32, #tpu.memory_space<vmem>>, %arg2: memref<2x128xf32, #tpu.memory_space<vmem>>, %arg3: memref<128x128xf32, #tpu.memory_space<vmem>>, %arg4: memref<128x128xf32, #tpu.memory_space<vmem>>) attributes {dimension_semantics = [#tpu.dimension_semantics<parallel>], iteration_bounds = array<i64: 2>, scalar_prefetch = 0 : i64, scratch_operands = 0 : i64, tpu.core_type = #tpu.core_type<tc>, window_params = [{transform_indices = @transform_0, window_bounds = array<i64: 128, 2>}, {pipeline_mode = #tpu.pipeline_mode<synchronous>, transform_indices = @transform_1, window_bounds = array<i64: 2, 128>}, {pipeline_mode = #tpu.pipeline_mode<synchronous>, transform_indices = @transform_2, window_bounds = array<i64: 128, 128>}, {transform_indices = @transform_3, window_bounds = array<i64: 128, 128>}]} {
    %c0 = arith.constant 0 : index
    %c0_0 = arith.constant 0 : index
    %0 = vector.load %arg1[%c0, %c0_0] : memref<128x2xf32, #tpu.memory_space<vmem>>, vector<128x2xf32>
    %c0_1 = arith.constant 0 : index
    %c0_2 = arith.constant 0 : index
    %1 = vector.load %arg2[%c0_1, %c0_2] : memref<2x128xf32, #tpu.memory_space<vmem>>, vector<2x128xf32>
    %2 = vector.extract_strided_slice %0 {offsets = [0, 0], sizes = [128, 1], strides = [1, 1]} : vector<128x2xf32> to vector<128x1xf32>
    %3 = vector.extract_strided_slice %1 {offsets = [0, 0], sizes = [1, 128], strides = [1, 1]} : vector<2x128xf32> to vector<1x128xf32>
    %4 = vector.broadcast %2 : vector<128x1xf32> to vector<128x128xf32>
    %5 = vector.broadcast %3 : vector<1x128xf32> to vector<128x128xf32>
    %6 = arith.mulf %4, %5 : vector<128x128xf32>
    %7 = vector.extract_strided_slice %0 {offsets = [0, 1], sizes = [128, 1], strides = [1, 1]} : vector<128x2xf32> to vector<128x1xf32>
    %8 = vector.extract_strided_slice %1 {offsets = [1, 0], sizes = [1, 128], strides = [1, 1]} : vector<2x128xf32> to vector<1x128xf32>
    %9 = vector.broadcast %7 : vector<128x1xf32> to vector<128x128xf32>
    %10 = vector.broadcast %8 : vector<1x128xf32> to vector<128x128xf32>
    %11 = arith.mulf %9, %10 : vector<128x128xf32>
    %12 = arith.addf %6, %11 : vector<128x128xf32>
    %13 = math.tanh %12 : vector<128x128xf32>
    %c0_3 = arith.constant 0 : index
    %c0_4 = arith.constant 0 : index
    %14 = vector.load %arg3[%c0_3, %c0_4] : memref<128x128xf32, #tpu.memory_space<vmem>>, vector<128x128xf32>
    %cst = arith.constant dense<0.000000e+00> : vector<128x128xf32>
    %15 = tpu.matmul %13, %14, %cst {dimension_numbers = #tpu.dot_dimension_numbers<[1], [0], [0], [1], [0, 0, 1, 1], [], []>} : vector<128x128xf32>, vector<128x128xf32>, vector<128x128xf32> -> vector<128x128xf32>
    %c0_5 = arith.constant 0 : index
    %c0_6 = arith.constant 0 : index
    %16 = vector.load %arg4[%c0_5, %c0_6] : memref<128x128xf32, #tpu.memory_space<vmem>>, vector<128x128xf32>
    tpu.vector_store %arg4[%c0_5, %c0_6], %15 {strides = array<i32>} : memref<128x128xf32, #tpu.memory_space<vmem>>, vector<128x128xf32>,
    return
  }
  func.func @transform_0(%arg0: i32) -> (i32, i32) {
    %c0_i32 = arith.constant 0 : i32
    %c0_i32_0 = arith.constant 0 : i32
    return %arg0, %c0_i32 : i32, i32
  }
  func.func @transform_1(%arg0: i32) -> (i32, i32) {
    %c0_i32 = arith.constant 0 : i32
    %c0_i32_0 = arith.constant 0 : i32
    %c0_i32_1 = arith.constant 0 : i32
    return %c0_i32, %c0_i32_0 : i32, i32
  }
  func.func @transform_2(%arg0: i32) -> (i32, i32) {
    %c0_i32 = arith.constant 0 : i32
    %c0_i32_0 = arith.constant 0 : i32
    %c0_i32_1 = arith.constant 0 : i32
    return %c0_i32, %c0_i32_0 : i32, i32
  }
  func.func @transform_3(%arg0: i32) -> (i32, i32) {
    %c0_i32 = arith.constant 0 : i32
    %c0_i32_0 = arith.constant 0 : i32
    return %arg0, %c0_i32 : i32, i32
  }
}

</mosaic_0001>

<bundles_post_ra>
// kernel: tpu_custom_call.1
= control target key start
LH: loop header
LB: loop body
LE: loop exit
PB: predicated region body
PF: predicated region fallthrough
CT: control target
= control target key end

     0   :  { %8 = vsyncpa [#allocation3], 0  ;;  %s1042_s0 = inlined_call_operand.vmem [shape: f32[256,2], index: 0, kind: input, shape index: {}]   ;;  %s1043_s1 = inlined_call_operand.vmem [shape: f32[2,128], index: 1, kind: input, shape index: {}]   ;;  %s1044_s2 = inlined_call_operand.vmem [shape: f32[128,128], index: 2, kind: input, shape index: {}]   ;;  %s1045_s3 = inlined_call_operand.hbm [shape: f32[256,128], index: 3, kind: output, shape index: {}]  }
   0x1   :  { %10 = vsyncpa [#allocation3 + $0x1], 0  ;;  %s814_s12 = smov 0   ;;  %s816_s13 = smov 0  }
   0x2   :  { %s818_s14 = smov 0   ;;  %s820_s15 = smov 0  }
   0x3 LB: > { %s835_s16 = sadd.s32 4294967295, %s788_s15   ;;  %s574_s17 = sadd.s32 4294967294, %s788_s15   ;;  %s788_s15 = sphi %s820_s15, %s1051_s15   ;;  %s784_s14 = sphi %s818_s14, %s1050_s14   ;;  %s780_s13 = sphi %s816_s13, %s1049_s13   ;;  %s776_s12 = sphi %s814_s12, %s1048_s12  }
   0x4   : > { %s839_s18 = sadd.s32 1, %s788_s15   ;;  %s91_s19 = sadd.s32 1, %s784_s14 }
   0x5   : > { %s88_s20 = ssub.s32 %s788_s15, %s839_s18  ;;  %p101_p0 = scmp.ne.s32.totalorder %s784_s14, %s780_s13 }
   0x6   : > { %p89_p1 = scmp.eq.s32.totalorder %s88_s20, 0  ;;  %p102_p2 = scmp.eq.s32.totalorder %s835_s16, 1 }
   0x7   : > { %p107_p3 = scmp.ne.s32.totalorder %s780_s13, %s776_s12  ;;  %p108_p4 = scmp.eq.s32.totalorder %s574_s17, 1 }
   0x8   : > { %s850_s21 = scalar_select %p89_p1, %s784_s14, %s91_s19  }
   0x9   : > { %p852_p5 = por %p102_p2, %p101_p0  ;;  %p856_p6 = por %p108_p4, %p107_p3 }
   0xa   : > { %p577_p7 = scmp.ge.s32.totalorder %s788_s15, 1  ;;  %p141_p8 = scmp.lt.s32.totalorder %s788_s15, 3 }
   0xc   : > { %p142_p9 = pnand %p577_p7, %p141_p8 }
   0xd   : > { %s579_s24 = sshll.u32 (!%p142_p9), %s835_s16, 4  ;;  %s162_s27 = sand.u32 (!%p142_p9), 1, %s780_s13  }
   0xe   : > { %145 = sbr.rel (%p142_p9) target bundleno = 373 (0x175), region = 32  ;;  %p166_p10 = scmp.lt.s32.totalorder (!%p142_p9), %s579_s24, 31 }
   0xf   : > { %s578_s29 = sshll.u32 (!%p142_p9), %s162_s27, 7  ;;  %s586_s4 = sshll.u32 (!%p142_p9), %s835_s16, 7 }
  0x10   : > { %s990_s30 = scalar_lea.vmem (!%p142_p9), [#allocation2], %s578_s29  ;;  %s508_s7 = scalar_lea.hbm (!%p142_p9), %s1045_s3, %s586_s4 }
  0x11   : > { %s509_s8 = sshll.u32 (!%p142_p9), %s990_s30, 4  ;;  %s511_s9 = sshll.u32 (!%p142_p9), %s508_s7, 4  ;;  %s510_s8 = int_to_ptr.vmem [resolvable:$true] %s509_s8  ;;  %s512_s9 = int_to_ptr.hbm [resolvable:$true] %s511_s9 }
  0x12   : > { %s497_s10 = scalar_lea.sflag (!%p142_p9), [#allocation3], %s162_s27  ;;  %s740_s11 = sshra.s32 (!%p142_p9), %s512_s9, 4  ;;  %s741_s11 = int_to_ptr.hbm [resolvable:$true] %s740_s11 }
  0x13   : > { %v790_v0 = vmov 1   ;;  %v791_v1 = vmov 0   ;;  %s1053_s24 = smov (!%p166_p10, %s579_s24), 31  ;;  %v414_v16 = vld [vmem:[%s1044_s2 + $0x78] sm:$0xff]  ;;  %v413_v17 = vld [vmem:[%s1044_s2 + $0x70] sm:$0xff]  ;;  %v412_v18 = vld [vmem:[%s1044_s2 + $0x68] sm:$0xff]  ;;  %p747_p0 = scmp.lt.s32.totalorder %s741_s11, %s1045_s3 }
  0x14   : > { %679 = vset.pattern.permute.xlu1 %v790_v0  ;;  %678 = vset.pattern.permute.xlu0 %v791_v1  ;;  %s580_s25 = sshll.u32 %s1053_s24, 3  ;;  %v411_v19 = vld [vmem:[%s1044_s2 + $0x60] sm:$0xff]  ;;  %v410_v21 = vld [vmem:[%s1044_s2 + $0x58] sm:$0xff]  ;;  %v409_v22 = vld [vmem:[%s1044_s2 + $0x50] sm:$0xff]  ;;  %s742_s17 = scalar_lea.hbm %s741_s11, 128 }
  0x15   : > { %680 = vset.pattern.permute.xlu2 %v791_v1  ;;  %s869_s28 = scalar_lea.vmem %s1042_s0, %s580_s25  ;;  %588 = vmatpush.msra.mxu2 %v414_v16  ;;  %v408_v23 = vld [vmem:[%s1044_s2 + $0x48] sm:$0xff]  ;;  %v407_v24 = vld [vmem:[%s1044_s2 + $0x40] sm:$0xff]  ;;  %v406_v25 = vld [vmem:[%s1044_s2 + $0x38] sm:$0xff]  ;;  %p743_p11 = scmp.ne.s32.totalorder %s741_s11, %s742_s17 }
  0x16   : > { %v180_v2 = vld [vmem:[%s869_s28 + $0x40] sm:$0xff]  ;;  %v186_v6 = vld [vmem:[%s869_s28 + $0x70] sm:$0xff]  ;;  %v181_v7 = vld [vmem:[%s869_s28 + $0x48] sm:$0xff]  ;;  %589 = vmatpush.msra.mxu3 %v414_v16  ;;  %587 = vmatpush.msra.mxu1 %v414_v16  ;;  %s746_s20 = scalar_lea.hbm %s1045_s3, 256 }
  0x17   : > { %v172_v3 = vld [vmem:[%s869_s28] sm:$0xff]  ;;  %319 = vperm.xlu1 %679, %v180_v2   ;;  %231 = vperm.xlu0 %678, %v180_v2   ;;  %v185_v8 = vld [vmem:[%s869_s28 + $0x68] sm:$0xff]  ;;  %v182_v11 = vld [vmem:[%s869_s28 + $0x50] sm:$0xff]  ;;  %p744_p12 = pnand %p743_p11, %p852_p5  ;;  %p748_p1 = scmp.lt.s32.totalorder %s746_s20, %s742_s17 }
  0x18   : > { %191 = vperm.xlu2 %680, %v172_v3   ;;  %v184_v4 = vld [vmem:[%s869_s28 + $0x60] sm:$0xff]  ;;  %v173_v9 = vld [vmem:[%s869_s28 + $0x8] sm:$0xff]  ;;  %v174_v12 = vld [vmem:[%s869_s28 + $0x10] sm:$0xff]  ;;  %415 = vmatpush.msra.mxu0 %v414_v16 }
  0x19   : > { %v176_v5 = vld [vmem:[%s869_s28 + $0x20] sm:$0xff]  ;;  %v177_v10 = vld [vmem:[%s869_s28 + $0x28] sm:$0xff]  ;;  %v187_v13 = vld [vmem:[%s869_s28 + $0x78] sm:$0xff]  ;;  %591 = vmatpush.msra.mxu2 %v413_v17  ;;  %592 = vmatpush.msra.mxu3 %v413_v17  ;;  %p745_p13 = pneg %p744_p12  ;;  %p749_p2 = por %p748_p1, %p747_p0 }
  0x1a   : > { %v178_v14 = vld [vmem:[%s869_s28 + $0x30] sm:$0xff]  ;;  %v175_v15 = vld [vmem:[%s869_s28 + $0x18] sm:$0xff]  ;;  %590 = vmatpush.msra.mxu1 %v413_v17  ;;  %416 = vmatpush.msra.mxu0 %v413_v17  ;;  %v404_v27 = vld [vmem:[%s1044_s2 + $0x28] sm:$0xff] }
  0x1b   : > { %v183_v20 = vld [vmem:[%s869_s28 + $0x58] sm:$0xff]  ;;  %594 = vmatpush.msra.mxu2 %v412_v18  ;;  %595 = vmatpush.msra.mxu3 %v412_v18  ;;  %v405_v26 = vld [vmem:[%s1044_s2 + $0x30] sm:$0xff]  ;;  %v403_v28 = vld [vmem:[%s1044_s2 + $0x20] sm:$0xff]  ;;  %p750_p3 = pnand %p749_p2, %p745_p13 }
  0x1c   : > { %593 = vmatpush.msra.mxu1 %v412_v18  ;;  %417 = vmatpush.msra.mxu0 %v412_v18  ;;  %v402_v29 = vld [vmem:[%s1044_s2 + $0x18] sm:$0xff]  ;;  %v401_v31 = vld [vmem:[%s1044_s2 + $0x10] sm:$0xff]  ;;  %v400_v32 = vld [vmem:[%s1044_s2 + $0x8] sm:$0xff] }
  0x1d   : > { %597 = vmatpush.msra.mxu2 %v411_v19  ;;  %598 = vmatpush.msra.mxu3 %v411_v19  ;;  %v179_v30 = vld [vmem:[%s869_s28 + $0x38] sm:$0xff]  ;;  %v399_v34 = vld [vmem:[%s1044_s2] sm:$0xff] }
  0x1e   : > { %596 = vmatpush.msra.mxu1 %v411_v19  ;;  %418 = vmatpush.msra.mxu0 %v411_v19  ;;  %v188_v37 = vld [vmem:[%s1043_s1] sm:$0x3] }
  0x1f   : > { %335 = vperm.xlu1 %679, %v184_v4   ;;  %251 = vperm.xlu0 %678, %v184_v4   ;;  %v951_v38 = vperm.slane %v188_v37, 0  ;;  %v953_v39 = vperm.slane %v188_v37, 1 }
  0x20   : > { %211 = vperm.xlu2 %680, %v176_v5   ;;  %600 = vmatpush.msra.mxu2 %v410_v21 }
  0x21   : > { %601 = vmatpush.msra.mxu3 %v410_v21  ;;  %599 = vmatpush.msra.mxu1 %v410_v21 }
  0x22   : > { %603 = vmatpush.msra.mxu2 %v409_v22  ;;  %419 = vmatpush.msra.mxu0 %v410_v21 }
  0x23   : > { %604 = vmatpush.msra.mxu3 %v409_v22  ;;  %602 = vmatpush.msra.mxu1 %v409_v22 }
  0x24   : > { %606 = vmatpush.msra.mxu2 %v408_v23  ;;  %420 = vmatpush.msra.mxu0 %v409_v22 }
  0x25   : > { %607 = vmatpush.msra.mxu3 %v408_v23  ;;  %605 = vmatpush.msra.mxu1 %v408_v23 }
  0x26   : > { %609 = vmatpush.msra.mxu2 %v407_v24  ;;  %421 = vmatpush.msra.mxu0 %v408_v23 }
  0x27   : > { %261 = vperm.xlu0 %678, %v186_v6   ;;  %303 = vperm.xlu1 %679, %v176_v5  }
  0x28   : > { %236 = vperm.xlu2 %680, %v181_v7   ;;  %610 = vmatpush.msra.mxu3 %v407_v24 }
  0x29   : > { %612 = vmatpush.msra.mxu2 %v406_v25  ;;  %608 = vmatpush.msra.mxu1 %v407_v24 }
  0x2a   : > { %613 = vmatpush.msra.mxu3 %v406_v25  ;;  %422 = vmatpush.msra.mxu0 %v407_v24 }
  0x2b   : > { %615 = vmatpush.msra.mxu2 %v405_v26  ;;  %611 = vmatpush.msra.mxu1 %v406_v25 }
  0x2c   : > { %616 = vmatpush.msra.mxu3 %v405_v26  ;;  %423 = vmatpush.msra.mxu0 %v406_v25 }
  0x2d   : > { %618 = vmatpush.msra.mxu2 %v404_v27  ;;  %614 = vmatpush.msra.mxu1 %v405_v26 }
  0x2e   : > { %619 = vmatpush.msra.mxu3 %v404_v27  ;;  %424 = vmatpush.msra.mxu0 %v405_v26 }
  0x2f   : > { %685 = vset.pattern.permute.xlu0 %v790_v0  ;;  %681 = vset.pattern.permute.xlu1 %v791_v1 }
  0x30   : > { %256 = vperm.xlu1 %681, %v185_v8   ;;  %287 = vperm.xlu0 %685, %v172_v3  }
  0x31   : > { %682 = vset.pattern.permute.xlu2 %v790_v0  ;;  %621 = vmatpush.msra.mxu2 %v403_v28 }
  0x32   : > { %323 = vperm.xlu2 %682, %v181_v7   ;;  %622 = vmatpush.msra.mxu3 %v403_v28 }
  0x33   : > { %624 = vmatpush.msra.mxu2 %v402_v29  ;;  %617 = vmatpush.msra.mxu1 %v404_v27 }
  0x34   : > { %625 = vmatpush.msra.mxu3 %v402_v29  ;;  %425 = vmatpush.msra.mxu0 %v404_v27 }
  0x35   : > { %627 = vmatpush.msra.mxu2 %v401_v31  ;;  %620 = vmatpush.msra.mxu1 %v403_v28 }
  0x36   : > { %628 = vmatpush.msra.mxu3 %v401_v31  ;;  %426 = vmatpush.msra.mxu0 %v403_v28 }
  0x37   : > { %630 = vmatpush.msra.mxu2 %v400_v32  ;;  %623 = vmatpush.msra.mxu1 %v402_v29 }
  0x38   : > { %196 = vperm.xlu1 %681, %v173_v9   ;;  %339 = vperm.xlu0 %685, %v185_v8  }
  0x39   : > { %631 = vmatpush.msra.mxu3 %v400_v32  ;;  %633 = vmatpush.msra.mxu2 %v399_v34 }
  0x3a   : > { %683 = vset.pattern.permute.xlu2 %v791_v1  ;;  %626 = vmatpush.msra.mxu1 %v401_v31 }
  0x3b   : > { %216 = vperm.xlu2 %683, %v177_v10   ;;  %634 = vmatpush.msra.mxu3 %v399_v34 }
  0x3c   : > { %629 = vmatpush.msra.mxu1 %v400_v32  ;;  %427 = vmatpush.msra.mxu0 %v402_v29 }
  0x3e   : > { %632 = vmatpush.msra.mxu1 %v399_v34  ;;  %428 = vmatpush.msra.mxu0 %v401_v31 }
  0x40   : > { %684 = vset.pattern.permute.xlu1 %v790_v0  ;;  %291 = vperm.xlu0 %685, %v173_v9  }
  0x41   : > { %307 = vperm.xlu1 %684, %v177_v10   ;;  %429 = vmatpush.msra.mxu0 %v400_v32 }
  0x43   : > { %241 = vperm.xlu2 %683, %v182_v11   ;;  %430 = vmatpush.msra.mxu0 %v399_v34 }
  0x48   : > { %295 = vperm.xlu0 %685, %v174_v12  }
  0x49   : > { %327 = vperm.xlu1 %684, %v182_v11  }
  0x4b   : > { %686 = vset.pattern.permute.xlu2 %v790_v0 }
  0x4c   : > { %343 = vperm.xlu2 %686, %v186_v6  }
  0x50   : > { %347 = vperm.xlu0 %685, %v187_v13  }
  0x51   : > { %687 = vset.pattern.permute.xlu1 %v791_v1 }
  0x52   : > { %201 = vperm.xlu1 %687, %v174_v12  }
  0x54   : > { %688 = vset.pattern.permute.xlu2 %v791_v1 }
  0x55   : > { %221 = vperm.xlu2 %688, %v178_v14  }
  0x58   : > { %299 = vperm.xlu0 %685, %v175_v15  }
  0x5a   : > { %689 = vset.pattern.permute.xlu1 %v790_v0 }
  0x5b   : > { %311 = vperm.xlu1 %689, %v178_v14  }
  0x5d   : > { %246 = vperm.xlu2 %688, %v183_v20  }
  0x63   : > { %690 = vset.pattern.permute.xlu1 %v791_v1 }
  0x64   : > { %266 = vperm.xlu1 %690, %v187_v13  }
  0x65   : > { %691 = vset.pattern.permute.xlu2 %v790_v0 }
  0x66   : > { %331 = vperm.xlu2 %691, %v183_v20  }
  0x6c   : > { %206 = vperm.xlu1 %690, %v175_v15  }
  0x6e   : > { %692 = vset.pattern.permute.xlu2 %v791_v1 }
  0x6f   : > { %226 = vperm.xlu2 %692, %v179_v30  }
  0x72   : > { %v192_v33 = vpop.permute.xlu2 %191 }
  0x73   : > { %v270_v2 = vmul.f32 %v951_v38, %v192_v33 }
  0x74   : > { %693 = vset.pattern.permute.xlu1 %v790_v0 }
  0x75   : > { %315 = vperm.xlu1 %693, %v179_v30  }
  0x7a   : > { %v212_v35 = vpop.permute.xlu2 %211 }
  0x7b   : > { %v274_v59 = vmul.f32 %v951_v38, %v212_v35 }
  0x82   : > { %v237_v36 = vpop.permute.xlu2 %236 }
  0x83   : > { %v279_v44 = vmul.f32 %v951_v38, %v237_v36 }
  0x89   : > { %v320_v40 = vpop.permute.xlu1 %319  ;;  %v232_v41 = vpop.permute.xlu0 %231 }
  0x8a   : > { %v359_v42 = vmul.f32 %v953_v39, %v320_v40  ;;  %v278_v43 = vmul.f32 %v951_v38, %v232_v41 }
  0x8c   : > { %v375_v45 = vadd.f32 %v359_v42, %v278_v43  ;;  %v324_v46 = vpop.permute.xlu2 %323 }
  0x8d   : > { %v360_v47 = vmul.f32 %v953_v39, %v324_v46 }
  0x8e   : > { %694 = vtanh.f32 %v375_v45 }
  0x8f   : > { %v376_v48 = vadd.f32 %v360_v47, %v279_v44 }
  0x91   : > { %v336_v49 = vpop.permute.xlu1 %335  ;;  %v252_v50 = vpop.permute.xlu0 %251  ;;  %696 = vtanh.f32 %v376_v48 }
  0x92   : > { %v363_v51 = vmul.f32 %v953_v39, %v336_v49  ;;  %v282_v52 = vmul.f32 %v951_v38, %v252_v50 }
  0x94   : > { %v695_v53 = vpop.eup %694  ;;  %v379_v54 = vadd.f32 %v363_v51, %v282_v52 }
  0x95   : > { %455 = vmatmul.f32.vlgmr.msra.gmra.mxu2 %v695_v53  ;;  %v217_v55 = vpop.permute.xlu2 %216 }
  0x96   : > { %698 = vtanh.f32 %v379_v54  ;;  %v275_v16 = vmul.f32 %v951_v38, %v217_v55 }
  0x97   : > { %v697_v58 = vpop.eup %696 }
  0x99   : > { %v304_v56 = vpop.permute.xlu1 %303  ;;  %v262_v57 = vpop.permute.xlu0 %261 }
  0x9a   : > { %v355_v60 = vmul.f32 %v953_v39, %v304_v56  ;;  %v284_v13 = vmul.f32 %v951_v38, %v262_v57 }
  0x9c   : > { %v699_v61 = vpop.eup %698  ;;  %v371_v62 = vadd.f32 %v355_v60, %v274_v59 }
  0x9d   : > { %458 = vmatmul.f32.gmra.mxu2 %v697_v58  ;;  %467 = vmatmul.f32.vlgmr.msra.gmra.mxu3 %v699_v61  ;;  %v242_v63 = vpop.permute.xlu2 %241 }
  0x9e   : > { %700 = vtanh.f32 %v371_v62  ;;  %v280_v29 = vmul.f32 %v951_v38, %v242_v63 }
  0xa2   : > { %v257_v0 = vpop.permute.xlu1 %256  ;;  %v288_v1 = vpop.permute.xlu0 %287 }
  0xa3   : > { %v351_v3 = vmul.f32 %v953_v39, %v288_v1  ;;  %v283_v9 = vmul.f32 %v951_v38, %v257_v0 }
  0xa4   : > { %v701_v4 = vpop.eup %700 }
  0xa5   : > { %v367_v5 = vadd.f32 %v351_v3, %v270_v2  ;;  %443 = vmatmul.f32.vlgmr.msra.gmra.mxu1 %v701_v4 }
  0xa6   : > { %v344_v6 = vpop.permute.xlu2 %343 }
  0xa7   : > { %702 = vtanh.f32 %v367_v5  ;;  %v365_v14 = vmul.f32 %v953_v39, %v344_v6 }
  0xa9   : > { %v381_v17 = vadd.f32 %v365_v14, %v284_v13 }
  0xaa   : > { %v197_v7 = vpop.permute.xlu1 %196  ;;  %v340_v8 = vpop.permute.xlu0 %339 }
  0xab   : > { %v364_v10 = vmul.f32 %v953_v39, %v340_v8  ;;  %v271_v19 = vmul.f32 %v951_v38, %v197_v7 }
  0xad   : > { %v703_v11 = vpop.eup %702  ;;  %v380_v12 = vadd.f32 %v364_v10, %v283_v9 }
  0xae   : > { %431 = vmatmul.f32.vlgmr.msra.gmra.mxu0 %v703_v11 }
  0xaf   : > { %704 = vtanh.f32 %v380_v12  ;;  %v222_v15 = vpop.permute.xlu2 %221 }
  0xb0   : > { %706 = vtanh.f32 %v381_v17  ;;  %v276_v47 = vmul.f32 %v951_v38, %v222_v15 }
  0xb2   : > { %v292_v18 = vpop.permute.xlu0 %291 }
  0xb3   : > { %v352_v20 = vmul.f32 %v953_v39, %v292_v18  ;;  %v308_v21 = vpop.permute.xlu1 %307 }
  0xb4   : > { %v356_v22 = vmul.f32 %v953_v39, %v308_v21 }
  0xb5   : > { %v705_v23 = vpop.eup %704  ;;  %v368_v24 = vadd.f32 %v352_v20, %v271_v19 }
  0xb6   : > { %v372_v25 = vadd.f32 %v356_v22, %v275_v16  ;;  %470 = vmatmul.f32.gmra.mxu3 %v705_v23  ;;  %v707_v28 = vpop.eup %706 }
  0xb7   : > { %708 = vtanh.f32 %v368_v24  ;;  %v247_v26 = vpop.permute.xlu2 %246 }
  0xb8   : > { %710 = vtanh.f32 %v372_v25  ;;  %v281_v34 = vmul.f32 %v951_v38, %v247_v26 }
  0xba   : > { %v296_v40 = vpop.permute.xlu0 %295 }
  0xbb   : > { %v328_v27 = vpop.permute.xlu1 %327  ;;  %v353_v42 = vmul.f32 %v953_v39, %v296_v40 }
  0xbc   : > { %v361_v30 = vmul.f32 %v953_v39, %v328_v27 }
  0xbd   : > { %v709_v31 = vpop.eup %708 }
  0xbe   : > { %v711_v32 = vpop.eup %710  ;;  %v377_v33 = vadd.f32 %v361_v30, %v280_v29  ;;  %434 = vmatmul.f32.gmra.mxu0 %v709_v31  ;;  %473 = vmatmul.f32.gmra.mxu3 %v707_v28 }
  0xbf   : > { %446 = vmatmul.f32.gmra.mxu1 %v711_v32 }
  0xc0   : > { %712 = vtanh.f32 %v377_v33  ;;  %v332_v35 = vpop.permute.xlu2 %331 }
  0xc1   : > { %v362_v36 = vmul.f32 %v953_v39, %v332_v35 }
  0xc2   : > { %v348_v52 = vpop.permute.xlu0 %347 }
  0xc3   : > { %v378_v37 = vadd.f32 %v362_v36, %v281_v34  ;;  %v366_v54 = vmul.f32 %v953_v39, %v348_v52 }
  0xc4   : > { %v202_v41 = vpop.permute.xlu1 %201 }
  0xc5   : > { %v272_v43 = vmul.f32 %v951_v38, %v202_v41  ;;  %714 = vtanh.f32 %v378_v37 }
  0xc6   : > { %v713_v44 = vpop.eup %712 }
  0xc7   : > { %v369_v45 = vadd.f32 %v353_v42, %v272_v43  ;;  %461 = vmatmul.f32.gmra.mxu2 %v713_v44 }
  0xc9   : > { %716 = vtanh.f32 %v369_v45  ;;  %v227_v0 = vpop.permute.xlu2 %226 }
  0xca   : > { %v300_v58 = vpop.permute.xlu0 %299  ;;  %v277_v1 = vmul.f32 %v951_v38, %v227_v0 }
  0xcb   : > { %v715_v46 = vpop.eup %714  ;;  %v354_v60 = vmul.f32 %v953_v39, %v300_v58 }
  0xcd   : > { %v312_v48 = vpop.permute.xlu1 %311 }
  0xce   : > { %v357_v49 = vmul.f32 %v953_v39, %v312_v48 }
  0xcf   : > { %v717_v50 = vpop.eup %716  ;;  %464 = vmatmul.f32.gmra.mxu2 %v715_v46 }
  0xd0   : > { %v373_v51 = vadd.f32 %v357_v49, %v276_v47  ;;  %437 = vmatmul.f32.gmra.mxu0 %v717_v50 }
  0xd2   : > { %718 = vtanh.f32 %v373_v51 }
  0xd6   : > { %v267_v53 = vpop.permute.xlu1 %266 }
  0xd7   : > { %v285_v55 = vmul.f32 %v951_v38, %v267_v53 }
  0xd8   : > { %v719_v56 = vpop.eup %718 }
  0xd9   : > { %v382_v57 = vadd.f32 %v366_v54, %v285_v55  ;;  %449 = vmatmul.f32.gmra.mxu1 %v719_v56 }
  0xdb   : > { %720 = vtanh.f32 %v382_v57 }
  0xde   : > { %v207_v59 = vpop.permute.xlu1 %206 }
  0xdf   : > { %v273_v61 = vmul.f32 %v951_v38, %v207_v59 }
  0xe1   : > { %v721_v62 = vpop.eup %720  ;;  %v370_v63 = vadd.f32 %v354_v60, %v273_v61 }
  0xe2   : > { %476 = vmatmul.f32.gmra.mxu3 %v721_v62 }
  0xe3   : > { %722 = vtanh.f32 %v370_v63 }
  0xe7   : > { %v316_v2 = vpop.permute.xlu1 %315 }
  0xe8   : > { %v358_v3 = vmul.f32 %v953_v39, %v316_v2 }
  0xe9   : > { %v723_v4 = vpop.eup %722 }
  0xea   : > { %v374_v5 = vadd.f32 %v358_v3, %v277_v1  ;;  %440 = vmatmul.f32.gmra.mxu0 %v723_v4 }
  0xec   : > { %724 = vtanh.f32 %v374_v5 }
  0xf2   : > { %v725_v6 = vpop.eup %724 }
  0xf3   : > { %452 = vmatmul.f32.gmra.mxu1 %v725_v6 }
 0x118   : > { %v456_v7 = vpop.f32.mrf.mxu2 }
 0x119   : > { %488 = vst [vmem:[%s990_s30 + $0x40] sm:$0xff] %v456_v7 }
 0x120   : > { %v459_v38 = vpop.f32.mrf.mxu2  ;;  %v468_v39 = vpop.f32.mrf.mxu3 }
 0x121   : > { %489 = vst [vmem:[%s990_s30 + $0x48] sm:$0xff] %v459_v38 }
 0x122   : > { %492 = vst [vmem:[%s990_s30 + $0x60] sm:$0xff] %v468_v39  ;;  %v444_v8 = vpop.f32.mrf.mxu1 }
 0x123   : > { %484 = vst [vmem:[%s990_s30 + $0x20] sm:$0xff] %v444_v8 }
 0x12b   : > { %v432_v9 = vpop.f32.mrf.mxu0 }
 0x12c   : > { %480 = vst [vmem:[%s990_s30] sm:$0xff] %v432_v9 }
 0x139   : > { %v471_v10 = vpop.f32.mrf.mxu3 }
 0x13a   : > { %493 = vst [vmem:[%s990_s30 + $0x68] sm:$0xff] %v471_v10 }
 0x13b   : > { %v435_v11 = vpop.f32.mrf.mxu0 }
 0x13c   : > { %481 = vst [vmem:[%s990_s30 + $0x8] sm:$0xff] %v435_v11  ;;  %v447_v12 = vpop.f32.mrf.mxu1 }
 0x13d   : > { %485 = vst [vmem:[%s990_s30 + $0x28] sm:$0xff] %v447_v12 }
 0x141   : > { %v474_v13 = vpop.f32.mrf.mxu3 }
 0x142   : > { %494 = vst [vmem:[%s990_s30 + $0x70] sm:$0xff] %v474_v13 }
 0x14a   : > { %v462_v14 = vpop.f32.mrf.mxu2 }
 0x14b   : > { %490 = vst [vmem:[%s990_s30 + $0x50] sm:$0xff] %v462_v14 }
 0x14d   : > { %v438_v15 = vpop.f32.mrf.mxu0 }
 0x14e   : > { %482 = vst [vmem:[%s990_s30 + $0x10] sm:$0xff] %v438_v15 }
 0x152   : > { %v465_v16 = vpop.f32.mrf.mxu2 }
 0x153   : > { %491 = vst [vmem:[%s990_s30 + $0x58] sm:$0xff] %v465_v16 }
 0x156   : > { %v450_v17 = vpop.f32.mrf.mxu1 }
 0x157   : > { %486 = vst [vmem:[%s990_s30 + $0x30] sm:$0xff] %v450_v17 }
 0x165   : > { %v477_v18 = vpop.f32.mrf.mxu3 }
 0x166   : > { %495 = vst [vmem:[%s990_s30 + $0x78] sm:$0xff] %v477_v18 }
 0x167   : > { %v441_v19 = vpop.f32.mrf.mxu0 }
 0x168   : > { %483 = vst [vmem:[%s990_s30 + $0x18] sm:$0xff] %v441_v19 }
 0x170   : > { %v453_v20 = vpop.f32.mrf.mxu1 }
 0x171   : > { %487 = vst [vmem:[%s990_s30 + $0x38] sm:$0xff] %v453_v20 }
 0x172   : > { %753 = shalt.err (!%p750_p3)
}
 0x173   : > { %s792_s25 = smov 128   ;;  %s793_s26 = smov 8  }
 0x174   : > { %635 = dma.vmem_to_hbm [thread:$0]  (%p852_p5), %s510_s8, 2048, %s512_s9, %s497_s10, %s792_s25, %s792_s25, %s793_s26  }
 0x175 PF: > { %p641_p4 = scmp.ge.s32.totalorder %s788_s15, 2  ;;  %s526_s27 = sand.u32 1, %s776_s12  }
 0x176   : > { %s527_s29 = scalar_lea.sflag [#allocation3], %s526_s27 }
 0x177   : > { %p638_p7 = pnand %p641_p4, %p856_p6 }
 0x179   : > { %p639_p8 = pneg %p638_p7 }
 0x17b   : > { %771 = dma.done.wait (%p639_p8), %s527_s29, 2048  }
 0x17c   : > { %773 = vsyncadd (%p639_p8), %s527_s29, 4294965248  ;;  %p13_p9 = scmp.ge.s32.totalorder %s839_s18, 4   ;;  %s1048_s12 = smov %s780_s13 }
 0x17d   : > { %s1049_s13 = smov %s784_s14  ;;  %s1050_s14 = smov %s850_s21 }
 0x17e   : > { %s1051_s15 = smov %s839_s18  ;;  %15 = sbr.rel (!%p13_p9) target bundleno = 3 (0x3), region = 67 }
 0x183   :  { %533 = vsyncpa [#allocation3], 1 }
 0x184   :  { %535 = vsyncpa [#allocation3 + $0x1], 1 }

</bundles_post_ra>
